<compile_context>
chip_gen: v7x
topology: tpu7x:2x2x1
jax: 0.10.0
libtpu: 0.0.40
codegen_flags: <defaults>
</compile_context>

<pallas_src>
import functools

import jax
import jax.numpy as jnp
from jax import lax
from jax.experimental import pallas as pl
from jax.experimental.pallas import tpu as pltpu

TINY_NUMBER = 1e-6

LANES = 128   # vreg lane width (minor dim of every tile)
SUB = 8       # vreg sublane count


# --------------------------------------------------------------------------
# Generation-aware defaults
# --------------------------------------------------------------------------
@functools.lru_cache(maxsize=1)
def _device_kind():
    try:
        return jax.devices()[0].device_kind.lower()
    except Exception:  # pragma: no cover - no TPU visible
        return ""


def _is_v7x():
    kind = _device_kind()
    return ("v7" in kind) or ("tpu7" in kind)


def _default_num_cores():
    # v7x exposes 2 TensorCores per chip; shard the leading grid axis across
    # them with CORE_PARALLEL.  Single-TC chips (v5e / v6e) keep a unit axis
    # so medium inputs are not split into smaller tiles for nothing.
    return 2 if _is_v7x() else 1


def _default_block_rows():
    # (block_rows, 128) f32 tiles.  2048 keeps the masked path (inputs x
    # double-buffering + elementwise temporaries, ~8-10 MiB) under v5e's
    # 16 MiB default scoped VMEM; 4096 amortises the ~0.35us per-grid-step
    # overhead at v7x's 3.2 TB/s HBM and stays well under its 32 MiB default.
    return 4096 if _is_v7x() else 2048


# --------------------------------------------------------------------------
# In-kernel helpers
# --------------------------------------------------------------------------
def _fold_rows_to_tile(v):
    """Reduce an (R, 128) value to (8, 128) with tile-aligned vreg adds.

    R must be a static multiple of 8.  Eight independent accumulator chains
    (for ILP) followed by a small tree keep the live set at ~9 vregs, so no
    spills regardless of block size.  All slices are (8,128)-tile aligned.
    """
    rows = v.shape[0]
    n_tiles = rows // SUB
    n_acc = min(8, n_tiles)
    accs = [v[k * SUB:(k + 1) * SUB, :] for k in range(n_acc)]
    for k in range(n_acc, n_tiles):
        accs[k % n_acc] = accs[k % n_acc] + v[k * SUB:(k + 1) * SUB, :]
    out = accs[0]
    for a in accs[1:]:
        out = out + a
    return out


def _row_mask(sq, rows, block_rows, blocks_per_core):
    """Zero out rows of this block that lie past the logical end of the data.

    Select-based (jnp.where), so garbage (even NaN/Inf) in the out-of-bounds
    region of a boundary block cannot leak into the sum.
    """
    start = (pl.program_id(0) * blocks_per_core + pl.program_id(1)) * block_rows
    rid = lax.broadcasted_iota(jnp.int32, (block_rows, LANES), 0)
    return jnp.where(rid < (rows - start), sq, 0.0)


def _sse_kernel(x_ref, y_ref, o_ref, *, rows, block_rows, blocks_per_core,
                needs_mask):
    """Accumulate sum((x - y)^2) into the resident (8, 128) output block."""
    i = pl.program_id(1)

    @pl.when(i == 0)
    def _():
        o_ref[...] = jnp.zeros_like(o_ref)

    x = x_ref[...].astype(jnp.float32)
    y = y_ref[...].astype(jnp.float32)
    d = x - y
    sq = d * d
    if needs_mask:  # static Python bool: only emitted when the grid over-covers
        sq = _row_mask(sq, rows, block_rows, blocks_per_core)
    o_ref[...] += _fold_rows_to_tile(sq)


def _masked_sse_kernel(x_ref, y_ref, m_ref, o_ref, *, rows, block_rows,
                       blocks_per_core, needs_mask):
    """Accumulate sum((x - y)^2 * m) into the resident (8, 128) output block."""
    i = pl.program_id(1)

    @pl.when(i == 0)
    def _():
        o_ref[...] = jnp.zeros_like(o_ref)

    x = x_ref[...].astype(jnp.float32)
    y = y_ref[...].astype(jnp.float32)
    m = m_ref[...].astype(jnp.float32)
    d = x - y
    sq = d * d * m
    if needs_mask:
        sq = _row_mask(sq, rows, block_rows, blocks_per_core)
    o_ref[...] += _fold_rows_to_tile(sq)


# --------------------------------------------------------------------------
# Host-side driver
# --------------------------------------------------------------------------
def _sum_squared_diff(x_flat, y_flat, m_flat, *, max_block_rows, num_cores):
    """sum((x - y)^2 [* m]) over flat arrays via a lane-dense streaming kernel."""
    n = x_flat.shape[0]

    # Lane-dense (rows, 128) presentation.  Free reshape when n % 128 == 0;
    # otherwise pad the tail to the next multiple of 128 (pads are zeros and
    # contribute 0 to the sum).  The pad copy only happens for ragged sizes.
    rem = n % LANES
    if rem:
        pad = LANES - rem
        x_flat = jnp.concatenate([x_flat, jnp.zeros((pad,), x_flat.dtype)])
        y_flat = jnp.concatenate([y_flat, jnp.zeros((pad,), y_flat.dtype)])
        if m_flat is not None:
            m_flat = jnp.concatenate([m_flat, jnp.zeros((pad,), m_flat.dtype)])
    rows = x_flat.shape[0] // LANES

    x2 = x_flat.reshape(rows, LANES)
    y2 = y_flat.reshape(rows, LANES)
    m2 = m_flat.reshape(rows, LANES) if m_flat is not None else None

    if rows < SUB:
        # Tiny input: dispatch-dominated anyway; plain JAX is simpler & faster.
        d = x2.astype(jnp.float32) - y2.astype(jnp.float32)
        sq = d * d
        if m2 is not None:
            sq = sq * m2.astype(jnp.float32)
        return jnp.sum(sq)

    # block_rows: multiple of 8, >= 8, <= rows (so every DMA block start is in
    # bounds and the in-kernel fold is tile aligned).
    block_rows = max(SUB, min((max_block_rows // SUB) * SUB, (rows // SUB) * SUB))
    n_blocks = pl.cdiv(rows, block_rows)
    if n_blocks < num_cores:
        num_cores = 1
    blocks_per_core = pl.cdiv(n_blocks, num_cores)
    covered_rows = num_cores * blocks_per_core * block_rows
    needs_mask = covered_rows > rows  # partial tail block and/or duplicate block

    if num_cores * blocks_per_core > n_blocks:
        # Odd block count split across cores: clamp the duplicate trailing
        # grid step onto a valid block; the kernel's row mask zeroes it out.
        def in_map(p, i):
            return (jnp.minimum(p * blocks_per_core + i, n_blocks - 1), 0)
    else:
        def in_map(p, i):
            return (p * blocks_per_core + i, 0)

    def out_map(p, i):
        return (p, 0)  # one resident (8,128) accumulator block per core

    if num_cores > 1:
        semantics = (pltpu.CORE_PARALLEL, pltpu.ARBITRARY)
    else:
        semantics = ("arbitrary", "arbitrary")

    kernel = functools.partial(
        _sse_kernel if m2 is None else _masked_sse_kernel,
        rows=rows, block_rows=block_rows,
        blocks_per_core=blocks_per_core, needs_mask=needs_mask)

    operands = [x2, y2] if m2 is None else [x2, y2, m2]
    in_specs = [pl.BlockSpec((block_rows, LANES), in_map) for _ in operands]

    partial_sums = pl.pallas_call(
        kernel,
        out_shape=jax.ShapeDtypeStruct((num_cores * SUB, LANES), jnp.float32),
        grid_spec=pltpu.PrefetchScalarGridSpec(
            num_scalar_prefetch=0,
            grid=(num_cores, blocks_per_core),
            in_specs=in_specs,
            out_specs=pl.BlockSpec((SUB, LANES), out_map),
        ),
        compiler_params=pltpu.CompilerParams(dimension_semantics=semantics),
    )(*operands)

    # (num_cores*8, 128) per-core partials -> scalar (tiny XLA reduce).
    return jnp.sum(partial_sums)


def img2mse(x, y, mask=None, *, max_block_rows=None, num_cores=None):
    """JAX/Pallas equivalent of the IBRNet-style img2mse used by Criterion."""
    x = jnp.asarray(x)
    y = jnp.broadcast_to(jnp.asarray(y), x.shape)
    if max_block_rows is None:
        max_block_rows = _default_block_rows()
    if num_cores is None:
        num_cores = _default_num_cores()

    n_elems = x.size
    x_flat = x.reshape(-1)
    y_flat = y.reshape(-1)

    if mask is None:
        num = _sum_squared_diff(x_flat, y_flat, None,
                                max_block_rows=max_block_rows,
                                num_cores=num_cores)
        # NOTE: f32 n_elems is exact only below 2^24 elements (ray batches are
        # far smaller than that).
        return num / jnp.float32(n_elems)

    mask = jnp.asarray(mask)
    # Denominator on the compact mask, exactly as the torch reference:
    # sum(mask) * C.  No expanded-mask stream or kernel accumulator needed.
    den = jnp.sum(mask.astype(jnp.float32)) * jnp.float32(x.shape[-1])
    # Numerator mask stream: expanded per-element mask in bf16 (half the HBM
    # bytes of f32; exact for the usual 0/1 masks).
    m_flat = jnp.broadcast_to(mask.astype(jnp.bfloat16)[..., None],
                              x.shape).reshape(-1)
    num = _sum_squared_diff(x_flat, y_flat, m_flat,
                            max_block_rows=max_block_rows,
                            num_cores=num_cores)
    return num / (den + jnp.float32(TINY_NUMBER))


class Criterion:
    """Training criterion (forward pass of the PyTorch Criterion module)."""

    def forward(self, outputs, ray_batch, scalars_to_log):
        pred_rgb = outputs['rgb']
        pred_mask = (outputs['mask'].astype(jnp.float32)
                     if 'mask' in outputs else None)
        gt_rgb = ray_batch['rgb']
        loss = img2mse(pred_rgb, gt_rgb, pred_mask)
        return (loss, scalars_to_log)

    __call__ = forward


if __name__ == "__main__":
    key = jax.random.PRNGKey(0)
    k1, k2, k3, k4, k5, k6 = jax.random.split(key, 6)

    def ref_img2mse(x, y, mask=None):
        sq = (x - y) ** 2
        if mask is None:
            return jnp.mean(sq)
        return jnp.sum(sq * mask[..., None]) / (
            jnp.sum(mask) * x.shape[-1] + TINY_NUMBER)

    crit = Criterion()
    channels = 3

    # ---- Case 1: N % 128 == 0 (no-copy fast path); rows=12 => block_rows=8,
    # ----         two grid steps with a masked partial tail block.
    n1 = 512
    pred = jax.random.uniform(k1, (n1, channels), dtype=jnp.float32)
    gt = jax.random.uniform(k2, (n1, channels), dtype=jnp.float32)
    mask = (jax.random.uniform(k3, (n1,)) > 0.3).astype(jnp.float32)

    loss_m, _ = crit({'rgb': pred, 'mask': mask}, {'rgb': gt}, {})
    loss_p, _ = crit({'rgb': pred}, {'rgb': gt}, {})
    loss_m, loss_p = jax.block_until_ready((loss_m, loss_p))
    assert jnp.allclose(loss_m, ref_img2mse(pred, gt, mask),
                        rtol=1e-5, atol=1e-6), (loss_m, ref_img2mse(pred, gt, mask))
    assert jnp.allclose(loss_p, ref_img2mse(pred, gt),
                        rtol=1e-5, atol=1e-6), (loss_p, ref_img2mse(pred, gt))

    # ---- Case 2: bigger batch, single full block; also bf16 inputs.
    n2 = 4096
    p2 = jax.random.uniform(k4, (n2, channels), dtype=jnp.float32)
    g2 = jax.random.uniform(k5, (n2, channels), dtype=jnp.float32)
    m2 = (jax.random.uniform(k6, (n2,)) > 0.5).astype(jnp.float32)
    l2m = img2mse(p2, g2, m2)
    l2p = img2mse(p2, g2)
    p2b, g2b = p2.astype(jnp.bfloat16), g2.astype(jnp.bfloat16)
    l2b = img2mse(p2b, g2b, m2)
    l2m, l2p, l2b = jax.block_until_ready((l2m, l2p, l2b))
    assert jnp.allclose(l2m, ref_img2mse(p2, g2, m2), rtol=1e-5, atol=1e-6)
    assert jnp.allclose(l2p, ref_img2mse(p2, g2), rtol=1e-5, atol=1e-6)
    ref_b = ref_img2mse(p2b.astype(jnp.float32), g2b.astype(jnp.float32), m2)
    assert jnp.allclose(l2b, ref_b, rtol=1e-5, atol=1e-6), (l2b, ref_b)

    # ---- Case 3: ragged element count (3*1000 % 128 != 0) + tiny tiles so
    # ----         the grid has many accumulation steps.
    n3 = 1000
    p3 = jax.random.uniform(k1, (n3, channels), dtype=jnp.float32)
    g3 = jax.random.uniform(k2, (n3, channels), dtype=jnp.float32)
    m3 = (jax.random.uniform(k3, (n3,)) > 0.5).astype(jnp.float32)
    l3m = img2mse(p3, g3, m3, max_block_rows=8)
    l3p = img2mse(p3, g3, max_block_rows=8)
    l3m, l3p = jax.block_until_ready((l3m, l3p))
    assert jnp.allclose(l3m, ref_img2mse(p3, g3, m3), rtol=1e-5, atol=1e-6)
    assert jnp.allclose(l3p, ref_img2mse(p3, g3), rtol=1e-5, atol=1e-6)

    # ---- Case 4: tiny input -> plain-JAX fallback path.
    n4 = 16
    p4 = jax.random.uniform(k4, (n4, channels), dtype=jnp.float32)
    g4 = jax.random.uniform(k5, (n4, channels), dtype=jnp.float32)
    m4 = (jax.random.uniform(k6, (n4,)) > 0.5).astype(jnp.float32)
    l4m = jax.block_until_ready(img2mse(p4, g4, m4))
    assert jnp.allclose(l4m, ref_img2mse(p4, g4, m4), rtol=1e-5, atol=1e-6)

    print("KERNEL_OK")
</pallas_src>

<mosaic_0001>
module attributes {stable_mosaic.version = 11 : i64} {
  func.func @_masked_sse_kernel(%arg0: i32, %arg1: i32, %arg2: memref<8x128xf32, #tpu.memory_space<vmem>>, %arg3: memref<8x128xf32, #tpu.memory_space<vmem>>, %arg4: memref<8x128xbf16, #tpu.memory_space<vmem>>, %arg5: memref<8x128xf32, #tpu.memory_space<vmem>>) attributes {dimension_semantics = [#tpu.dimension_semantics<arbitrary>, #tpu.dimension_semantics<arbitrary>], iteration_bounds = array<i64: 1, 2>, scalar_prefetch = 0 : i64, scratch_operands = 0 : i64, tpu.core_type = #tpu.core_type<tc>, window_params = [{transform_indices = @transform_0, window_bounds = array<i64: 8, 128>}, {transform_indices = @transform_1, window_bounds = array<i64: 8, 128>}, {transform_indices = @transform_2, window_bounds = array<i64: 8, 128>}, {transform_indices = @transform_3, window_bounds = array<i64: 8, 128>}]} {
    %c0_i32 = arith.constant 0 : i32
    %0 = arith.cmpi eq, %arg1, %c0_i32 : i32
    %1 = arith.extui %0 : i1 to i32
    %c0_i32_0 = arith.constant 0 : i32
    %2 = arith.cmpi ne, %1, %c0_i32_0 : i32
    scf.if %2 {
      %cst_10 = arith.constant 0.000000e+00 : f32
      %22 = vector.broadcast %cst_10 : f32 to vector<8x128xf32>
      %c0_11 = arith.constant 0 : index
      %c0_12 = arith.constant 0 : index
      %23 = vector.load %arg5[%c0_11, %c0_12] : memref<8x128xf32, #tpu.memory_space<vmem>>, vector<8x128xf32>
      tpu.vector_store %arg5[%c0_11, %c0_12], %22 {strides = array<i32>} : memref<8x128xf32, #tpu.memory_space<vmem>>, vector<8x128xf32>,
    } else {
    }
    %c0 = arith.constant 0 : index
    %c0_1 = arith.constant 0 : index
    %3 = vector.load %arg2[%c0, %c0_1] : memref<8x128xf32, #tpu.memory_space<vmem>>, vector<8x128xf32>
    %c0_2 = arith.constant 0 : index
    %c0_3 = arith.constant 0 : index
    %4 = vector.load %arg3[%c0_2, %c0_3] : memref<8x128xf32, #tpu.memory_space<vmem>>, vector<8x128xf32>
    %c0_4 = arith.constant 0 : index
    %c0_5 = arith.constant 0 : index
    %5 = vector.load %arg4[%c0_4, %c0_5] : memref<8x128xbf16, #tpu.memory_space<vmem>>, vector<8x128xbf16>
    %6 = arith.extf %5 : vector<8x128xbf16> to vector<8x128xf32>
    %7 = arith.subf %3, %4 : vector<8x128xf32>
    %8 = arith.mulf %7, %7 : vector<8x128xf32>
    %9 = arith.mulf %8, %6 : vector<8x128xf32>
    %c2_i32 = arith.constant 2 : i32
    %10 = arith.muli %arg0, %c2_i32 : i32
    %11 = arith.addi %10, %arg1 : i32
    %c8_i32 = arith.constant 8 : i32
    %12 = arith.muli %11, %c8_i32 : i32
    %13 = tpu.iota {dimensions = array<i32: 0>} : vector<8x128xi32>
    %c12_i32 = arith.constant 12 : i32
    %14 = arith.subi %c12_i32, %12 : i32
    %15 = vector.broadcast %14 : i32 to vector<8x128xi32>
    %16 = arith.cmpi slt, %13, %15 : vector<8x128xi32>
    %cst = arith.constant 0.000000e+00 : f32
    %17 = vector.broadcast %cst : f32 to vector<8x128xf32>
    %18 = arith.select %16, %9, %17 : vector<8x128xi1>, vector<8x128xf32>
    %c0_6 = arith.constant 0 : index
    %c0_7 = arith.constant 0 : index
    %19 = vector.load %arg5[%c0_6, %c0_7] : memref<8x128xf32, #tpu.memory_space<vmem>>, vector<8x128xf32>
    %20 = arith.addf %19, %18 : vector<8x128xf32>
    %c0_8 = arith.constant 0 : index
    %c0_9 = arith.constant 0 : index
    %21 = vector.load %arg5[%c0_8, %c0_9] : memref<8x128xf32, #tpu.memory_space<vmem>>, vector<8x128xf32>
    tpu.vector_store %arg5[%c0_8, %c0_9], %20 {strides = array<i32>} : memref<8x128xf32, #tpu.memory_space<vmem>>, vector<8x128xf32>,
    return
  }
  func.func @transform_0(%arg0: i32, %arg1: i32) -> (i32, i32) {
    %c2_i32 = arith.constant 2 : i32
    %0 = arith.muli %arg0, %c2_i32 : i32
    %1 = arith.addi %0, %arg1 : i32
    %c0_i32 = arith.constant 0 : i32
    %c0_i32_0 = arith.constant 0 : i32
    return %1, %c0_i32 : i32, i32
  }
  func.func @transform_1(%arg0: i32, %arg1: i32) -> (i32, i32) {
    %c2_i32 = arith.constant 2 : i32
    %0 = arith.muli %arg0, %c2_i32 : i32
    %1 = arith.addi %0, %arg1 : i32
    %c0_i32 = arith.constant 0 : i32
    %c0_i32_0 = arith.constant 0 : i32
    return %1, %c0_i32 : i32, i32
  }
  func.func @transform_2(%arg0: i32, %arg1: i32) -> (i32, i32) {
    %c2_i32 = arith.constant 2 : i32
    %0 = arith.muli %arg0, %c2_i32 : i32
    %1 = arith.addi %0, %arg1 : i32
    %c0_i32 = arith.constant 0 : i32
    %c0_i32_0 = arith.constant 0 : i32
    return %1, %c0_i32 : i32, i32
  }
  func.func @transform_3(%arg0: i32, %arg1: i32) -> (i32, i32) {
    %c0_i32 = arith.constant 0 : i32
    %c0_i32_0 = arith.constant 0 : i32
    return %arg0, %c0_i32 : i32, i32
  }
}

</mosaic_0001>

<bundles_post_ra>
// kernel: tpu_custom_call.1
= control target key start
LH: loop header
LB: loop body
LE: loop exit
PB: predicated region body
PF: predicated region fallthrough
CT: control target
= control target key end

     0   :  { %8 = vsyncpa [#allocation3], 0  ;;  %s946_s0 = inlined_call_operand.hbm [shape: f32[12,128], index: 0, kind: input, shape index: {}]   ;;  %s947_s1 = inlined_call_operand.hbm [shape: f32[12,128], index: 1, kind: input, shape index: {}]   ;;  %s948_s2 = inlined_call_operand.hbm [shape: bf16[12,128], index: 2, kind: input, shape index: {}]   ;;  %s949_s3 = inlined_call_operand.hbm [shape: f32[8,128], index: 3, kind: output, shape index: {}]  }
   0x1   :  { %10 = vsyncpa [#allocation3 + $0x1], 0 }
   0x2   :  { %11 = vsyncpa [#allocation6], 0 }
   0x3   :  { %13 = vsyncpa [#allocation6 + $0x1], 0 }
   0x4   :  { %14 = vsyncpa [#allocation4], 0  ;;  %s722_s12 = smov 0   ;;  %s724_s13 = smov 0  }
   0x5   :  { %s726_s14 = smov 0   ;;  %s728_s15 = smov 0  }
   0x6   :  { %s730_s16 = smov 0   ;;  %s732_s17 = smov 0  }
   0x7 LB: > { %s751_s18 = sadd.s32 4294967295, %s695_s17   ;;  %s29_s19 = sadd.s32 1, %s691_s16  ;;  %s695_s17 = sphi %s732_s17, %s20_s17   ;;  %s691_s16 = sphi %s730_s16, %s964_s16   ;;  %s687_s15 = sphi %s728_s15, %s963_s15   ;;  %s683_s14 = sphi %s726_s14, %s962_s14   ;;  %s679_s13 = sphi %s724_s13, %s961_s13   ;;  %s675_s12 = sphi %s722_s12, %s960_s12  }
   0x8   : > { %p30_p0 = scmp.ge.s32.totalorder %s29_s19, 2  ;;  %s43_s20 = sadd.s32 1, %s683_s14 }
   0x9   : > { %p50_p1 = scmp.ne.s32.totalorder %s683_s14, %s679_s13  ;;  %p51_p2 = scmp.eq.s32.totalorder %s695_s17, 0 }
   0xa   : > { %s966_s19 = smov (%p30_p0, %s29_s19), 0  ;;  %p56_p4 = scmp.ne.s32.totalorder %s679_s13, %s675_s12 }
   0xb   : > { %p52_p3 = por %p51_p2, %p50_p1  ;;  %s40_s21 = ssub.s32 %s691_s16, %s966_s19 }
   0xc   : > { %p57_p5 = scmp.eq.s32.totalorder %s751_s18, 0  ;;  %p41_p6 = scmp.eq.s32.totalorder %s40_s21, 0 }
   0xd   : > { %p468_p8 = scmp.lt.s32.totalorder %s695_s17, 2  ;;  %s773_s24 = sand.u32 1, %s683_s14  }
   0xe   : > { %p764_p7 = por %p57_p5, %p56_p4  ;;  %s433_s25 = sshll.u32 %s691_s16, 7 }
   0xf   : > { %s770_s23 = scalar_select %p41_p6, %s683_s14, %s43_s20  }
  0x10   : > { %s952_s22 = scalar_select %p764_p7, 1, 0 }
  0x11   : > { %s432_s26 = sshll.u32 %s773_s24, 3  ;;  %p777_p9 = pnand %p468_p8, %p52_p3 }
  0x12   : > { %s186_s28 = sand.u32 1, %s695_s17   ;;  %s787_s4 = scalar_lea.hbm %s947_s1, %s433_s25 }
  0x13   : > { %s953_s27 = scalar_select %p777_p9, 1, 0 }
  0x14   : > { %s190_s5 = scalar_lea.vmem [#allocation5], %s432_s26  ;;  %s794_s7 = scalar_lea.sflag [#allocation6], %s186_s28 }
  0x15   : > { %s199_s6 = sshll.u32 %s190_s5, 4  ;;  %s521_s8 = scalar_lea.hbm %s787_s4, 128  ;;  %s791_s6 = int_to_ptr.vmem [resolvable:$true] %s199_s6 }
  0x16   : > { %p522_p11 = scmp.ne.s32.totalorder %s787_s4, %s521_s8  ;;  %p800_p12 = pneg %p777_p9 }
  0x17   : > { %s526_s12 = scalar_lea.hbm %s947_s1, 256  ;;  %p527_p1 = scmp.lt.u32.totalorder %s787_s4, %s947_s1 }
  0x18   : > { %p524_p13 = pnand %p800_p12, %p522_p11  ;;  %p528_p2 = scmp.lt.u32.totalorder %s526_s12, %s521_s8 }
  0x19   : > { %p530_p4 = scmp.lt.u32.totalorder %s521_s8, %s787_s4 }
  0x1a   : > { %p525_p0 = pneg %p524_p13  ;;  %p529_p3 = por %p528_p2, %p527_p1 }
  0x1c   : > { %p531_p5 = por %p530_p4, %p529_p3 }
  0x1e   : > { %p532_p6 = pnand %p531_p5, %p525_p0 }
  0x20   : > { %535 = shalt.err (!%p532_p6)
}
  0x21   : > { %s536_s28 = scalar_lea.vmem %s791_s6, 128  ;;  %s697_s29 = smov [#allocation5]  }
  0x22   : > { %p537_p8 = scmp.ne.s32.totalorder %s791_s6, %s536_s28  ;;  %s541_s30 = sshll.u32 %s697_s29, 4  ;;  %s542_s30 = int_to_ptr.vmem [resolvable:$false] %s541_s30 }
  0x23   : > { %s543_s5 = scalar_lea.vmem %s542_s30, 256  ;;  %p544_p10 = scmp.lt.s32.totalorder %s791_s6, %s542_s30 }
  0x24   : > { %p539_p11 = pnand %p537_p8, %p800_p12  ;;  %p545_p7 = scmp.lt.s32.totalorder %s543_s5, %s536_s28 }
  0x26   : > { %p540_p13 = pneg %p539_p11  ;;  %p546_p1 = por %p545_p7, %p544_p10 }
  0x28   : > { %p547_p2 = pnand %p546_p1, %p540_p13 }
  0x2a   : > { %550 = shalt.err (!%p547_p2)
}
  0x2b   : > { %464 = dma.hbm_to_vmem [thread:$0]  (!%p777_p9), %s787_s4, 128, %s791_s6, %s794_s7  }
  0x2c   : > { %p224_p0 = scmp.lt.s32.totalorder %s695_s17, 3  ;;  %p955_p3 = scmp.ge.s32.totalorder %s695_s17, 1 }
  0x2d   : > { %s836_s12 = scalar_lea.hbm %s946_s0, %s433_s25  ;;  %s170_s20 = scalar_lea.vmem [#allocation2], %s432_s26 }
  0x2e   : > { %p827_p4 = pnand %p955_p3, %p224_p0  ;;  %s179_s21 = sshll.u32 %s170_s20, 4  ;;  %s840_s21 = int_to_ptr.vmem [resolvable:$true] %s179_s21 }
  0x2f   : > { %s436_s4 = sshll.u32 %s773_s24, 2  ;;  %s167_s6 = scalar_lea.sflag [#allocation3], %s773_s24 }
  0x30   : > { %s956_s8 = scalar_select %p827_p4, 1, 0 }
  0x31   : > { %s551_s28 = scalar_lea.hbm %s836_s12, 128  ;;  %s556_s25 = scalar_lea.hbm %s946_s0, 256 }
  0x32   : > { %p552_p7 = scmp.ne.s32.totalorder %s836_s12, %s551_s28  ;;  %p557_p6 = scmp.lt.u32.totalorder %s836_s12, %s946_s0 }
  0x33   : > { %p558_p8 = scmp.lt.u32.totalorder %s556_s25, %s551_s28  ;;  %p560_p13 = scmp.lt.u32.totalorder %s551_s28, %s836_s12 }
  0x34   : > { %p554_p10 = pnand %p552_p7, %p800_p12 }
  0x35   : > { %p559_p11 = por %p558_p8, %p557_p6 }
  0x36   : > { %p555_p5 = pneg %p554_p10 }
  0x37   : > { %p561_p1 = por %p560_p13, %p559_p11 }
  0x39   : > { %p562_p2 = pnand %p561_p1, %p555_p5 }
  0x3b   : > { %565 = shalt.err (!%p562_p2)
}
  0x3c   : > { %s566_s26 = scalar_lea.vmem %s840_s21, 128  ;;  %s698_s11 = smov [#allocation2]  }
  0x3d   : > { %p567_p0 = scmp.ne.s32.totalorder %s840_s21, %s566_s26  ;;  %s571_s20 = sshll.u32 %s698_s11, 4  ;;  %s572_s20 = int_to_ptr.vmem [resolvable:$false] %s571_s20 }
  0x3e   : > { %s573_s29 = scalar_lea.vmem %s572_s20, 256  ;;  %p574_p10 = scmp.lt.s32.totalorder %s840_s21, %s572_s20 }
  0x3f   : > { %p569_p3 = pnand %p567_p0, %p800_p12  ;;  %p575_p4 = scmp.lt.s32.totalorder %s573_s29, %s566_s26 }
  0x41   : > { %p570_p7 = pneg %p569_p3  ;;  %p576_p6 = por %p575_p4, %p574_p10 }
  0x43   : > { %p577_p8 = pnand %p576_p6, %p570_p7 }
  0x45   : > { %580 = shalt.err (!%p577_p8)
}
  0x46   : > { %461 = dma.hbm_to_vmem [thread:$0]  (!%p777_p9), %s836_s12, 128, %s840_s21, %s167_s6  }
  0x47   : > { %s437_s28 = sshll.u32 %s691_s16, 6  ;;  %s210_s10 = scalar_lea.vmem [#allocation7], %s436_s4 }
  0x48   : > { %s869_s5 = scalar_lea.hbm %s948_s2, %s437_s28  ;;  %s219_s26 = sshll.u32 %s210_s10, 4  ;;  %s220_s26 = int_to_ptr.vmem [resolvable:$true] %s219_s26 }
  0x49   : > { %s581_s11 = scalar_lea.hbm %s869_s5, 64  ;;  %s586_s6 = scalar_lea.hbm %s948_s2, 128 }
  0x4a   : > { %p582_p4 = scmp.ne.s32.totalorder %s869_s5, %s581_s11  ;;  %p587_p13 = scmp.lt.u32.totalorder %s869_s5, %s948_s2 }
  0x4b   : > { %p588_p1 = scmp.lt.u32.totalorder %s586_s6, %s581_s11  ;;  %p590_p0 = scmp.lt.u32.totalorder %s581_s11, %s869_s5 }
  0x4c   : > { %p584_p5 = pnand %p582_p4, %p800_p12 }
  0x4d   : > { %p589_p2 = por %p588_p1, %p587_p13 }
  0x4e   : > { %p585_p11 = pneg %p584_p5 }
  0x4f   : > { %p591_p3 = por %p590_p0, %p589_p2 }
  0x51   : > { %p592_p7 = pnand %p591_p3, %p585_p11 }
  0x53   : > { %595 = shalt.err (!%p592_p7)
}
  0x54   : > { %s596_s24 = scalar_lea.vmem %s220_s26, 64  ;;  %s699_s4 = smov [#allocation7]  }
  0x55   : > { %p597_p10 = scmp.ne.s32.totalorder %s220_s26, %s596_s24  ;;  %s601_s28 = sshll.u32 %s699_s4, 4  ;;  %s602_s28 = int_to_ptr.vmem [resolvable:$false] %s601_s28 }
  0x56   : > { %s603_s30 = scalar_lea.vmem %s602_s28, 128  ;;  %p604_p4 = scmp.lt.s32.totalorder %s220_s26, %s602_s28 }
  0x57   : > { %p599_p6 = pnand %p597_p10, %p800_p12  ;;  %p605_p5 = scmp.lt.s32.totalorder %s603_s30, %s596_s24 }
  0x59   : > { %p600_p8 = pneg %p599_p6  ;;  %p606_p9 = por %p605_p5, %p604_p4 }
  0x5b   : > { %p607_p1 = pnand %p606_p9, %p600_p8 }
  0x5d   : > { %610 = shalt.err (!%p607_p1)
}
  0x5e   : > { %p957_p13 = scmp.ne.s32.totalorder %s953_s27, 0  ;;  %p958_p11 = scmp.ne.s32.totalorder %s956_s8, 0 }
  0x5f   : > { %s230_s9 = sand.u32 (!%p958_p11), 1, %s679_s13   ;;  %p959_p12 = scmp.ne.s32.totalorder (!%p958_p11), %s952_s22, 0 }
  0x60   : > { %467 = dma.hbm_to_vmem [thread:$0]  (!%p957_p13), %s869_s5, 64, %s220_s26, %s794_s7  }
  0x61   : > { %228 = sbr.rel (%p958_p11) target bundleno = 142 (0x8e), region = 32  ;;  %s439_s25 = sshll.u32 (!%p958_p11), %s230_s9, 3 }
  0x62   : > { %s231_s10 = scalar_lea.sflag (!%p958_p11), [#allocation3], %s230_s9  ;;  %s234_s11 = scalar_lea.vmem (!%p958_p11), [#allocation2], %s439_s25 }
  0x68   : > { %662 = dma.done.wait (%p959_p12), %s231_s10, 128  }
  0x69   : > { %664 = vsyncadd (%p959_p12), %s231_s10, 4294967168  ;;  %s239_s27 = sand.u32 1, %s751_s18   ;;  %s243_s21 = scalar_lea.vmem [#allocation5], %s439_s25 }
  0x6a   : > { %s240_s12 = scalar_lea.sflag [#allocation6], %s239_s27 }
  0x6b   : > { %666 = dma.done.wait (%p959_p12), %s240_s12, 192  }
  0x6c   : > { %668 = vsyncadd (%p959_p12), %s240_s12, 4294967104  ;;  %s441_s7 = sshll.u32 %s230_s9, 2  ;;  %p442_p9 = scmp.ne.s32.totalorder %s687_s15, 0 }
  0x6d   : > { %s252_s8 = scalar_lea.vmem [#allocation7], %s441_s7  ;;  %v700_v0 = vmov (!%p442_p9), 0.0  }
  0x6e   : > { %289 = sbr.rel (%p442_p9) target bundleno = 117 (0x75), region = 48  ;;  %290 = vst [vmem:[#allocation8] sm:$0xff] (!%p442_p9), %v700_v0 }
  0x75 PF: > { %v291_v1 = vld [vmem:[%s234_s11] sm:$0xff]  ;;  %v292_v2 = vld [vmem:[%s243_s21] sm:$0xff]  ;;  %s443_s5 = sshll.u32 %s687_s15, 3  ;;  %v301_v4 = vlaneseq  ;;  %s701_s22 = smov [#allocation8]  }
  0x76   : > { %v293_v3 = vld [vmem:[%s252_s8] sm:$0xf]  ;;  %v295_v6 = vsub.f32 %v291_v1, %v292_v2  ;;  %s303_s26 = ssub.s32 12, %s443_s5  ;;  %v307_v11 = vld [vmem:[#allocation8] sm:$0xff]  ;;  %s319_s6 = sshll.u32 %s701_s22, 4  ;;  %s320_s6 = int_to_ptr.vmem [resolvable:$true] %s319_s6 }
  0x77   : > { %v294_v5 = vunpack.c.l.bf16 %v293_v3  ;;  %v302_v7 = vshrl.u32 %v301_v4, 7  ;;  %v304_v8 = vstv %s303_s26  ;;  %p469_p2 = scmp.eq.s32.totalorder %s751_s18, 1  ;;  %s611_s20 = scalar_lea.vmem %s320_s6, 128 }
  0x78   : > { %v296_v9 = vmul.f32 %v295_v6, %v295_v6  ;;  %p612_p0 = scmp.ne.s32.totalorder %s320_s6, %s611_s20  ;;  %p618_p10 = scmp.lt.s32.totalorder %s320_s6, %s320_s6 }
  0x79   : > { %vm305_vm0 = vcmp.lt.s32.totalorder %v302_v7, %v304_v8  ;;  %p619_p6 = scmp.lt.s32.totalorder %s611_s20, %s611_s20 }
  0x7a   : > { %v297_v10 = vmul.f32 %v296_v9, %v294_v5  ;;  %p613_p3 = pnand %p612_p0, %p469_p2 }
  0x7b   : > { %p620_p8 = por %p619_p6, %p618_p10 }
  0x7c   : > { %v306_v12 = vsel %vm305_vm0, %v297_v10, 0.0  ;;  %p614_p7 = pneg %p613_p3 }
  0x7d   : > { %v308_v13 = vadd.f32 %v307_v11, %v306_v12 }
  0x7e   : > { %p621_p4 = pnand %p620_p8, %p614_p7 }
  0x7f   : > { %309 = vst [vmem:[#allocation8] sm:$0xff] %v308_v13 }
  0x80   : > { %624 = shalt.err (!%p621_p4)
}
  0x81   : > { %s625_s24 = scalar_lea.hbm %s949_s3, 128 }
  0x82   : > { %p626_p5 = scmp.ne.s32.totalorder %s949_s3, %s625_s24  ;;  %p631_p11 = scmp.lt.u32.totalorder %s625_s24, %s949_s3 }
  0x84   : > { %p627_p1 = pnand %p626_p5, %p469_p2 }
  0x86   : > { %p628_p13 = pneg %p627_p1 }
  0x88   : > { %p633_p12 = pnand %p631_p11, %p628_p13 }
  0x8a   : > { %636 = shalt.err (!%p633_p12)
}
  0x8b   : > { %455 = dma.vmem_to_hbm [thread:$0]  (%p469_p2), %s320_s6, 128, %s949_s3, [#allocation4]  }
  0x8c   : > { %670 = dma.done.wait (%p469_p2), [#allocation4], 128  }
  0x8d   : > { %672 = vsyncadd (%p469_p2), [#allocation4], 4294967168 }
  0x8e PF: > { %s20_s17 = sadd.s32 1, %s695_s17   ;;  %s960_s12 = smov %s679_s13 }
  0x8f   : > { %p17_p9 = scmp.ge.s32.totalorder %s20_s17, 4   ;;  %s961_s13 = smov %s683_s14 }
  0x90   : > { %s962_s14 = smov %s770_s23  ;;  %s963_s15 = smov %s691_s16 }
  0x91   : > { %s964_s16 = smov %s966_s19  ;;  %19 = sbr.rel (!%p17_p9) target bundleno = 7 (0x7), region = 98 }
  0x98   :  { %332 = vsyncpa [#allocation3], 1 }
  0x99   :  { %334 = vsyncpa [#allocation3 + $0x1], 1 }
  0x9a   :  { %335 = vsyncpa [#allocation6], 1 }
  0x9b   :  { %337 = vsyncpa [#allocation6 + $0x1], 1 }
  0x9c   :  { %338 = vsyncpa [#allocation4], 1 }
  0x9d   :  { %340 = vsyncpa [#allocation4 + $0x1], 1 }

</bundles_post_ra>
